<compile_context>
chip_gen: v5e
topology: v5e:2x2
jax: 0.10.0
libtpu: 0.0.40
codegen_flags: <defaults>
</compile_context>

<pallas_src>
import jax
import jax.numpy as jnp
from jax.experimental import pallas as pl
from jax.experimental.pallas import tpu as pltpu

_LANE = 128
_SUBLANE = 8
_VMEM_LIMIT = 32 * 1024 * 1024  # explicit scoped-VMEM budget (fits every gen)


def _round_up(x, m):
    return (x + m - 1) // m * m


def _pick_tile(n, target, unit):
    """Largest tile <= target that divides n and is a multiple of `unit`.
    If n <= target the whole axis is a single (full-dim) block, which is
    always a legal TPU block shape."""
    if n <= target:
        return n
    t = (target // unit) * unit
    while t >= unit:
        if n % t == 0:
            return t
        t -= unit
    return n


def _sigmoid(x):
    # EUP-friendly sigmoid: 0.5*(tanh(x/2)+1) -- avoids the VPU divide of
    # 1/(1+exp(-x)); tanh runs on the otherwise-idle EUP slot.
    return 0.5 * (jnp.tanh(0.5 * x) + 1.0)


# ---------------------------------------------------------------------------
# pl.Buffered(1) feature probe: single-buffer resident (constant-index) weight
# operands when supported (halves their VMEM footprint); otherwise fall back
# to the default double-buffered BlockSpec.
# ---------------------------------------------------------------------------
_SINGLE_BUFFER_OK = None


def _single_buffer_supported():
    global _SINGLE_BUFFER_OK
    if _SINGLE_BUFFER_OK is not None:
        return _SINGLE_BUFFER_OK
    try:
        def _probe(a_ref, w_ref, o_ref, acc_ref):
            acc_ref[...] = a_ref[...] + w_ref[...]
            o_ref[...] = acc_ref[...]

        out = pl.pallas_call(
            _probe,
            out_shape=jax.ShapeDtypeStruct((_SUBLANE, _LANE), jnp.float32),
            grid=(1, 1),
            in_specs=[
                pl.BlockSpec((_SUBLANE, _LANE), lambda i, j: (0, 0)),
                pl.BlockSpec((_SUBLANE, _LANE), lambda i, j: (0, 0),
                             pipeline_mode=pl.Buffered(1)),
            ],
            out_specs=pl.BlockSpec((_SUBLANE, _LANE), lambda i, j: (0, 0)),
            scratch_shapes=[pltpu.VMEM((_SUBLANE, _LANE), jnp.float32)],
            compiler_params=pltpu.CompilerParams(
                dimension_semantics=("parallel", "arbitrary")),
        )(jnp.zeros((_SUBLANE, _LANE), jnp.float32),
          jnp.ones((_SUBLANE, _LANE), jnp.float32))
        jax.block_until_ready(out)
        _SINGLE_BUFFER_OK = bool(jnp.allclose(out, 1.0))
    except Exception:
        _SINGLE_BUFFER_OK = False
    return _SINGLE_BUFFER_OK


def _resident_spec(block_shape, index_map):
    """BlockSpec for an operand whose block index never changes (weights)."""
    if _single_buffer_supported():
        return pl.BlockSpec(block_shape, index_map, pipeline_mode=pl.Buffered(1))
    return pl.BlockSpec(block_shape, index_map)


# ---------------------------------------------------------------------------
# Kernel 1: embedding lookup via one-hot @ table (MXU, bf16 operands).
# ---------------------------------------------------------------------------
def embedding_lookup(ids_flat, table, *, drop_mask=None, out_dtype=jnp.bfloat16,
                     row_tile_target=256):
    # TODO(synk): for non-toy vocab sizes replace the one-hot matmul with a
    # scalar-prefetch / DMA row gather; the (V, E) table must currently fit VMEM.
    n = ids_flat.shape[0]
    v, e = table.shape
    rt = _pick_tile(n, row_tile_target, _SUBLANE)
    assert n % rt == 0
    has_mask = drop_mask is not None

    def kernel(*refs):
        if has_mask:
            ids_ref, table_ref, mask_ref, out_ref = refs
        else:
            ids_ref, table_ref, out_ref = refs
        ids = ids_ref[...]                                          # (rt, 1) int32
        iota = jax.lax.broadcasted_iota(
            jnp.int32, (ids.shape[0], table_ref.shape[0]), 1)
        onehot = (iota == ids).astype(table_ref.dtype)              # exact 0/1 in bf16
        acc = jnp.dot(onehot, table_ref[...],
                      preferred_element_type=jnp.float32)           # (rt, E) f32
        if has_mask:
            acc = acc * mask_ref[...].astype(jnp.float32)           # fused dropout
        out_ref[...] = acc.astype(out_ref.dtype)

    in_specs = [
        pl.BlockSpec((rt, 1), lambda i: (i, 0)),
        _resident_spec((v, e), lambda i: (0, 0)),   # table stays VMEM-resident
    ]
    args = [ids_flat, table]
    if has_mask:
        in_specs.append(pl.BlockSpec((rt, e), lambda i: (i, 0)))
        args.append(drop_mask)

    return pl.pallas_call(
        kernel,
        out_shape=jax.ShapeDtypeStruct((n, e), out_dtype),
        grid=(n // rt,),
        in_specs=in_specs,
        out_specs=pl.BlockSpec((rt, e), lambda i: (i, 0)),
        compiler_params=pltpu.CompilerParams(
            dimension_semantics=("parallel",),
            vmem_limit_bytes=_VMEM_LIMIT),
    )(*args)


# ---------------------------------------------------------------------------
# Kernel 2: single-layer LSTM (PyTorch gate order i,f,g,o), time-chunked grid,
# h/c state in VMEM scratch, lane-padded gates, bf16 MXU operands.
# ---------------------------------------------------------------------------
def lstm_forward(x_tbe, w_ih_t, w_hh_t, bias, lengths_b1, *,
                 time_chunk_target=8, batch_tile=None):
    t_len, b, ep = x_tbe.shape
    hp = w_hh_t.shape[0]
    assert w_ih_t.shape == (ep, 4 * hp) and w_hh_t.shape == (hp, 4 * hp)

    tc = _pick_tile(t_len, time_chunk_target, 1)
    if batch_tile is None:
        # For v7x megacore pass batch_tile=b//2 so the two TensorCores split
        # batches along the "parallel" axis; with one TC a full-batch tile wins.
        bt = b if b <= 8 else _pick_tile(b, 8, 8)
    else:
        bt = batch_tile
    assert b % bt == 0 and t_len % tc == 0
    assert bt == b or bt % _SUBLANE == 0

    def kernel(x_ref, wih_ref, whh_ref, b_ref, len_ref, y_ref, h_ref, c_ref):
        ct = pl.program_id(1)

        @pl.when(ct == 0)
        def _():
            h_ref[...] = jnp.zeros_like(h_ref)
            c_ref[...] = jnp.zeros_like(c_ref)

        wih = wih_ref[...]            # (Ep, 4Hp) bf16, resident
        whh = whh_ref[...]            # (Hp, 4Hp) bf16, resident
        gate_bias = b_ref[...]        # (1, 4Hp) f32
        lens = len_ref[...]           # (bt, 1) int32
        t0 = ct * tc

        def step(tau, carry):
            h, c = carry                                            # f32 (bt, Hp)
            x_t = x_ref[tau]                                        # bf16 (bt, Ep)
            gates = (
                jnp.dot(x_t, wih, preferred_element_type=jnp.float32)
                + jnp.dot(h.astype(whh.dtype), whh,
                          preferred_element_type=jnp.float32)
                + gate_bias)                                        # (bt, 4Hp) f32
            # Hp is a multiple of 128 -> each gate slice is a full lane slab.
            i_g = _sigmoid(gates[:, 0 * hp:1 * hp])
            f_g = _sigmoid(gates[:, 1 * hp:2 * hp])
            g_g = jnp.tanh(gates[:, 2 * hp:3 * hp])
            o_g = _sigmoid(gates[:, 3 * hp:4 * hp])
            c_new = f_g * c + i_g * g_g
            h_new = o_g * jnp.tanh(c_new)
            # pack/pad_packed semantics: zero outputs at padded positions.
            # (h/c keep updating past the length; only `outputs` is returned.)
            valid = ((t0 + tau) < lens).astype(h_new.dtype)         # (bt, 1)
            y_ref[tau] = (h_new * valid).astype(y_ref.dtype)
            return h_new, c_new

        h_fin, c_fin = jax.lax.fori_loop(
            0, tc, step, (h_ref[...], c_ref[...]), unroll=True)
        h_ref[...] = h_fin
        c_ref[...] = c_fin

    return pl.pallas_call(
        kernel,
        out_shape=jax.ShapeDtypeStruct((t_len, b, hp), jnp.bfloat16),
        grid=(b // bt, t_len // tc),                     # time innermost/sequential
        in_specs=[
            pl.BlockSpec((tc, bt, ep), lambda cb, ct: (ct, cb, 0)),
            _resident_spec((ep, 4 * hp), lambda cb, ct: (0, 0)),
            _resident_spec((hp, 4 * hp), lambda cb, ct: (0, 0)),
            _resident_spec((1, 4 * hp), lambda cb, ct: (0, 0)),
            pl.BlockSpec((bt, 1), lambda cb, ct: (cb, 0)),
        ],
        out_specs=pl.BlockSpec((tc, bt, hp), lambda cb, ct: (ct, cb, 0)),
        scratch_shapes=[
            pltpu.VMEM((bt, hp), jnp.float32),           # h state
            pltpu.VMEM((bt, hp), jnp.float32),           # c state
        ],
        compiler_params=pltpu.CompilerParams(
            dimension_semantics=("parallel", "arbitrary"),
            vmem_limit_bytes=_VMEM_LIMIT),
    )(x_tbe, w_ih_t, w_hh_t, bias, lengths_b1)


# ---------------------------------------------------------------------------
# Kernel 3: output projection, (rows x vocab-tile) grid, lane-dense output.
# ---------------------------------------------------------------------------
def linear(x, w_t, bvec, *, drop_mask=None, row_tile_target=256,
           vocab_tile_target=512):
    n, hp = x.shape
    v = w_t.shape[1]
    rt = _pick_tile(n, row_tile_target, _SUBLANE)
    vt = _pick_tile(v, vocab_tile_target, _LANE)
    has_mask = drop_mask is not None

    def kernel(*refs):
        if has_mask:
            x_ref, w_ref, b_ref, mask_ref, out_ref = refs
        else:
            x_ref, w_ref, b_ref, out_ref = refs
        xv = x_ref[...]
        if has_mask:
            xv = xv * mask_ref[...]                     # fused input dropout
        acc = jnp.dot(xv, w_ref[...], preferred_element_type=jnp.float32)
        out_ref[...] = (acc + b_ref[...]).astype(out_ref.dtype)

    in_specs = [
        pl.BlockSpec((rt, hp), lambda i, j: (i, 0)),
        pl.BlockSpec((hp, vt), lambda i, j: (0, j)),    # vocab-tiled weight stream
        pl.BlockSpec((1, vt), lambda i, j: (0, j)),
    ]
    args = [x, w_t, bvec]
    if has_mask:
        in_specs.append(pl.BlockSpec((rt, hp), lambda i, j: (i, 0)))
        args.append(drop_mask)

    return pl.pallas_call(
        kernel,
        out_shape=jax.ShapeDtypeStruct((n, v), jnp.float32),
        grid=(n // rt, v // vt),
        in_specs=in_specs,
        out_specs=pl.BlockSpec((rt, vt), lambda i, j: (i, j)),
        compiler_params=pltpu.CompilerParams(
            dimension_semantics=("parallel", "parallel"),
            vmem_limit_bytes=_VMEM_LIMIT),
    )(*args)


# ---------------------------------------------------------------------------
# Parameter prep: bf16 matmul operands, lane-padded embed/hidden dims with the
# PyTorch (i,f,g,o) gate order preserved. Padding is exact: padded lanes see
# zero weights/bias, so h/c stay 0 there and hit zero output-weight rows.
# ---------------------------------------------------------------------------
def _pad_gate_weight_t(w, h, hp, in_dim, in_dim_p):
    out = jnp.zeros((in_dim_p, 4 * hp), jnp.float32)
    for k in range(4):
        blk = w[k * h:(k + 1) * h, :].T                 # (in_dim, h)
        out = out.at[:in_dim, k * hp:k * hp + h].set(blk)
    return out.astype(jnp.bfloat16)


def _pad_gate_bias(bvec, h, hp):
    out = jnp.zeros((1, 4 * hp), jnp.float32)
    for k in range(4):
        out = out.at[0, k * hp:k * hp + h].set(bvec[k * h:(k + 1) * h])
    return out


def prepare_lm_params(params):
    v, e = params["embedding"].shape
    h = params["w_hh"].shape[1]
    ep = _round_up(e, _LANE)
    hp = _round_up(h, _LANE)
    table = jnp.pad(params["embedding"], ((0, 0), (0, ep - e))).astype(jnp.bfloat16)
    w_ih_t = _pad_gate_weight_t(params["w_ih"], h, hp, e, ep)      # (Ep, 4Hp)
    w_hh_t = _pad_gate_weight_t(params["w_hh"], h, hp, h, hp)      # (Hp, 4Hp)
    bias = _pad_gate_bias(params["b_ih"] + params["b_hh"], h, hp)  # (1, 4Hp)
    w_out_t = jnp.pad(params["w_out"].T, ((0, hp - h), (0, 0))).astype(jnp.bfloat16)
    b_out = params["b_out"].reshape(1, v).astype(jnp.float32)
    return dict(table=table, w_ih_t=w_ih_t, w_hh_t=w_hh_t, bias=bias,
                w_out_t=w_out_t, b_out=b_out, v=v, ep=ep, hp=hp)


def init_lm_params(key, vocab_size, embed_size, hidden_size):
    k = jax.random.split(key, 6)
    s = 0.1
    return {
        "embedding": jax.random.normal(k[0], (vocab_size, embed_size), jnp.float32) * s,
        "w_ih": jax.random.normal(k[1], (4 * hidden_size, embed_size), jnp.float32) * s,
        "w_hh": jax.random.normal(k[2], (4 * hidden_size, hidden_size), jnp.float32) * s,
        "b_ih": jax.random.normal(k[3], (4 * hidden_size,), jnp.float32) * s,
        "b_hh": jax.random.normal(k[4], (4 * hidden_size,), jnp.float32) * s,
        "w_out": jax.random.normal(k[5], (vocab_size, hidden_size), jnp.float32) * s,
        "b_out": jnp.zeros((vocab_size,), jnp.float32),
    }


# ---------------------------------------------------------------------------
# Full LM.forward
# ---------------------------------------------------------------------------
def lm_forward(params, inputs, lengths=None, *, dropout=0.0, training=False,
               rng=None):
    b, t = inputs.shape
    p = prepare_lm_params(params)
    v, ep, hp = p["v"], p["ep"], p["hp"]

    if lengths is None:
        lengths = jnp.full((b,), t, dtype=jnp.int32)
    lengths_b1 = lengths.astype(jnp.int32).reshape(b, 1)

    use_drop = training and dropout > 0.0
    if use_drop:
        if rng is None:
            rng = jax.random.PRNGKey(0)
        k_emb, k_out = jax.random.split(rng)
        scale = 1.0 / (1.0 - dropout)
        mask_emb = (jax.random.bernoulli(k_emb, 1.0 - dropout, (t * b, ep))
                    * scale).astype(jnp.bfloat16)
        mask_out = (jax.random.bernoulli(k_out, 1.0 - dropout, (b * t, hp))
                    * scale).astype(jnp.bfloat16)
    else:
        mask_emb = mask_out = None

    # 1) Embedding lookup written directly in time-major row order, so the
    #    (T, B, Ep) LSTM input needs no activation transpose (only the tiny
    #    int32 id matrix is transposed). Dropout is fused into the kernel.
    ids_tm = inputs.T.reshape(t * b, 1).astype(jnp.int32)
    emb = embedding_lookup(ids_tm, p["table"], drop_mask=mask_emb)   # (T*B, Ep) bf16
    x_tbe = emb.reshape(t, b, ep)

    # 2) LSTM over time (time-chunked grid, VMEM-resident state & weights).
    y_tbh = lstm_forward(x_tbe, p["w_ih_t"], p["w_hh_t"], p["bias"], lengths_b1)

    # 3) Output projection. The single remaining layout transpose is on the
    #    small side (bf16 hidden states), so (B, T, V) logits come out of the
    #    kernel already batch-major. Dropout fused into the projection input.
    y_rows = y_tbh.transpose(1, 0, 2).reshape(b * t, hp)
    logits = linear(y_rows, p["w_out_t"], p["b_out"], drop_mask=mask_out)
    return logits.reshape(b, t, v)


# ---------------------------------------------------------------------------
# Pure-JAX reference (eval mode, f32) for correctness checking.
# ---------------------------------------------------------------------------
def _reference_forward(params, inputs, lengths):
    b, t = inputs.shape
    h = params["w_hh"].shape[1]
    emb = jnp.take(params["embedding"], inputs, axis=0)              # (B, T, E)
    w_ih_t = params["w_ih"].T
    w_hh_t = params["w_hh"].T
    bias = params["b_ih"] + params["b_hh"]

    def sig(x):
        return 1.0 / (1.0 + jnp.exp(-x))

    def step(carry, x_t):
        hs, cs = carry
        gates = x_t @ w_ih_t + hs @ w_hh_t + bias
        i = sig(gates[:, :h])
        f = sig(gates[:, h:2 * h])
        g = jnp.tanh(gates[:, 2 * h:3 * h])
        o = sig(gates[:, 3 * h:])
        cs = f * cs + i * g
        hs = o * jnp.tanh(cs)
        return (hs, cs), hs

    x_tbe = emb.transpose(1, 0, 2)
    init = (jnp.zeros((b, h), jnp.float32), jnp.zeros((b, h), jnp.float32))
    _, ys = jax.lax.scan(step, init, x_tbe)
    y = ys.transpose(1, 0, 2)                                         # (B, T, H)
    mask = (jnp.arange(t)[None, :] < lengths[:, None]).astype(y.dtype)[..., None]
    y = y * mask
    return y @ params["w_out"].T + params["b_out"]


if __name__ == "__main__":
    vocab_size, embed_size, hidden_size = 128, 16, 32
    batch, seq = 2, 8
    dropout = 0.1

    key = jax.random.PRNGKey(0)
    k_param, k_tok = jax.random.split(key)
    params = init_lm_params(k_param, vocab_size, embed_size, hidden_size)
    tokens = jax.random.randint(k_tok, (batch, seq), 0, vocab_size, jnp.int32)
    lengths = jnp.array([seq, seq - 3], dtype=jnp.int32)

    logits = lm_forward(params, tokens, lengths, dropout=dropout, training=False)
    logits = jax.block_until_ready(logits)

    ref = jax.block_until_ready(_reference_forward(params, tokens, lengths))

    ok = logits.shape == (batch, seq, vocab_size)
    ok = ok and bool(jnp.all(jnp.isfinite(logits)))
    # bf16 MXU operands (f32 accumulation) -> slightly looser tolerance vs f32 ref.
    ok = ok and bool(jnp.allclose(logits, ref, atol=2e-2, rtol=2e-2))

    if ok:
        print("KERNEL_OK")
    else:
        print("MISMATCH max_abs_diff=", float(jnp.max(jnp.abs(logits - ref))))
</pallas_src>

<mosaic_0001>
module attributes {stable_mosaic.version = 11 : i64} {
  func.func @_probe(%arg0: i32, %arg1: i32, %arg2: memref<8x128xf32, #tpu.memory_space<vmem>>, %arg3: memref<8x128xf32, #tpu.memory_space<vmem>>, %arg4: memref<8x128xf32, #tpu.memory_space<vmem>>, %arg5: memref<8x128xf32, #tpu.memory_space<vmem>>) attributes {dimension_semantics = [#tpu.dimension_semantics<parallel>, #tpu.dimension_semantics<arbitrary>], iteration_bounds = array<i64: 1, 1>, scalar_prefetch = 0 : i64, scratch_operands = 1 : i64, tpu.core_type = #tpu.core_type<tc>, window_params = [{pipeline_mode = #tpu.pipeline_mode<synchronous>, transform_indices = @transform_0, window_bounds = array<i64: 8, 128>}, {pipeline_mode = #tpu.pipeline_mode<synchronous>, transform_indices = @transform_1, window_bounds = array<i64: 8, 128>}, {pipeline_mode = #tpu.pipeline_mode<synchronous>, transform_indices = @transform_2, window_bounds = array<i64: 8, 128>}]} {
    %c0 = arith.constant 0 : index
    %c0_0 = arith.constant 0 : index
    %0 = vector.load %arg2[%c0, %c0_0] : memref<8x128xf32, #tpu.memory_space<vmem>>, vector<8x128xf32>
    %c0_1 = arith.constant 0 : index
    %c0_2 = arith.constant 0 : index
    %1 = vector.load %arg3[%c0_1, %c0_2] : memref<8x128xf32, #tpu.memory_space<vmem>>, vector<8x128xf32>
    %2 = arith.addf %0, %1 : vector<8x128xf32>
    %c0_3 = arith.constant 0 : index
    %c0_4 = arith.constant 0 : index
    %3 = vector.load %arg5[%c0_3, %c0_4] : memref<8x128xf32, #tpu.memory_space<vmem>>, vector<8x128xf32>
    tpu.vector_store %arg5[%c0_3, %c0_4], %2 {strides = array<i32>} : memref<8x128xf32, #tpu.memory_space<vmem>>, vector<8x128xf32>,
    %c0_5 = arith.constant 0 : index
    %c0_6 = arith.constant 0 : index
    %4 = vector.load %arg5[%c0_5, %c0_6] : memref<8x128xf32, #tpu.memory_space<vmem>>, vector<8x128xf32>
    %c0_7 = arith.constant 0 : index
    %c0_8 = arith.constant 0 : index
    %5 = vector.load %arg4[%c0_7, %c0_8] : memref<8x128xf32, #tpu.memory_space<vmem>>, vector<8x128xf32>
    tpu.vector_store %arg4[%c0_7, %c0_8], %4 {strides = array<i32>} : memref<8x128xf32, #tpu.memory_space<vmem>>, vector<8x128xf32>,
    return
  }
  func.func @transform_0(%arg0: i32, %arg1: i32) -> (i32, i32) {
    %c0_i32 = arith.constant 0 : i32
    %c0_i32_0 = arith.constant 0 : i32
    %c0_i32_1 = arith.constant 0 : i32
    return %c0_i32, %c0_i32_0 : i32, i32
  }
  func.func @transform_1(%arg0: i32, %arg1: i32) -> (i32, i32) {
    %c0_i32 = arith.constant 0 : i32
    %c0_i32_0 = arith.constant 0 : i32
    %c0_i32_1 = arith.constant 0 : i32
    return %c0_i32, %c0_i32_0 : i32, i32
  }
  func.func @transform_2(%arg0: i32, %arg1: i32) -> (i32, i32) {
    %c0_i32 = arith.constant 0 : i32
    %c0_i32_0 = arith.constant 0 : i32
    %c0_i32_1 = arith.constant 0 : i32
    return %c0_i32, %c0_i32_0 : i32, i32
  }
}

module attributes {stable_mosaic.version = 11 : i64} {
  func.func @kernel(%arg0: i32, %arg1: memref<16x1xi32, #tpu.memory_space<vmem>>, %arg2: memref<128x128xbf16, #tpu.memory_space<vmem>>, %arg3: memref<16x128xbf16, #tpu.memory_space<vmem>>) attributes {dimension_semantics = [#tpu.dimension_semantics<parallel>], iteration_bounds = array<i64: 1>, scalar_prefetch = 0 : i64, scratch_operands = 0 : i64, tpu.core_type = #tpu.core_type<tc>, window_params = [{transform_indices = @transform_0, window_bounds = array<i64: 16, 1>}, {pipeline_mode = #tpu.pipeline_mode<synchronous>, transform_indices = @transform_1, window_bounds = array<i64: 128, 128>}, {transform_indices = @transform_2, window_bounds = array<i64: 16, 128>}]} {
    %c0 = arith.constant 0 : index
    %c0_0 = arith.constant 0 : index
    %0 = vector.load %arg1[%c0, %c0_0] : memref<16x1xi32, #tpu.memory_space<vmem>>, vector<16x1xi32>
    %1 = tpu.iota {dimensions = array<i32: 1>} : vector<16x128xi32>
    %2 = vector.broadcast %0 : vector<16x1xi32> to vector<16x128xi32>
    %3 = arith.cmpi eq, %1, %2 : vector<16x128xi32>
    %4 = arith.extui %3 : vector<16x128xi1> to vector<16x128xi32>
    %5 = arith.sitofp %4 : vector<16x128xi32> to vector<16x128xf32>
    %6 = arith.truncf %5 : vector<16x128xf32> to vector<16x128xbf16>
    %c0_1 = arith.constant 0 : index
    %c0_2 = arith.constant 0 : index
    %7 = vector.load %arg2[%c0_1, %c0_2] : memref<128x128xbf16, #tpu.memory_space<vmem>>, vector<128x128xbf16>
    %cst = arith.constant dense<0.000000e+00> : vector<16x128xf32>
    %8 = tpu.matmul %6, %7, %cst {dimension_numbers = #tpu.dot_dimension_numbers<[1], [0], [0], [1], [0, 0, 1, 1], [], []>} : vector<16x128xbf16>, vector<128x128xbf16>, vector<16x128xf32> -> vector<16x128xf32>
    %9 = arith.truncf %8 : vector<16x128xf32> to vector<16x128xbf16>
    %c0_3 = arith.constant 0 : index
    %c0_4 = arith.constant 0 : index
    %10 = vector.load %arg3[%c0_3, %c0_4] : memref<16x128xbf16, #tpu.memory_space<vmem>>, vector<16x128xbf16>
    tpu.vector_store %arg3[%c0_3, %c0_4], %9 {strides = array<i32>} : memref<16x128xbf16, #tpu.memory_space<vmem>>, vector<16x128xbf16>,
    return
  }
  func.func @transform_0(%arg0: i32) -> (i32, i32) {
    %c0_i32 = arith.constant 0 : i32
    %c0_i32_0 = arith.constant 0 : i32
    return %arg0, %c0_i32 : i32, i32
  }
  func.func @transform_1(%arg0: i32) -> (i32, i32) {
    %c0_i32 = arith.constant 0 : i32
    %c0_i32_0 = arith.constant 0 : i32
    %c0_i32_1 = arith.constant 0 : i32
    return %c0_i32, %c0_i32_0 : i32, i32
  }
  func.func @transform_2(%arg0: i32) -> (i32, i32) {
    %c0_i32 = arith.constant 0 : i32
    %c0_i32_0 = arith.constant 0 : i32
    return %arg0, %c0_i32 : i32, i32
  }
}

</mosaic_0001>

<bundles_post_ra>
// kernel: tpu_custom_call.1
= control target key start
LH: loop header
LB: loop body
LE: loop exit
PB: predicated region body
PF: predicated region fallthrough
CT: control target
= control target key end

     0   :  { %7 = vsyncpa [#allocation4], 0  ;;  %s172_s0 = inlined_call_operand.hbm [shape: f32[8,128], index: 0, kind: input, shape index: {}]   ;;  %s173_s1 = inlined_call_operand.hbm [shape: f32[8,128], index: 1, kind: input, shape index: {}]   ;;  %s174_s2 = inlined_call_operand.hbm [shape: f32[8,128], index: 2, kind: output, shape index: {}]  }
   0x1   :  { %8 = vsyncpa [#allocation7], 0 }
   0x2   :  { %9 = vsyncpa [#allocation5], 0  ;;  %s15_s11 = sshll.u32 %s172_s0, 4  ;;  %s145_s12 = smov [#allocation3]   ;;  %s16_s11 = int_to_ptr.hbm [resolvable:$true] %s15_s11 }
   0x3   :  { %s17_s13 = sshll.u32 %s145_s12, 4  ;;  %s26_s16 = sshll.u32 %s173_s1, 4  ;;  %s18_s13 = int_to_ptr.vmem [resolvable:$true] %s17_s13  ;;  %s27_s16 = int_to_ptr.hbm [resolvable:$true] %s26_s16 }
   0x4   :  { %20 = dma.hbm_to_vmem [thread:$0]  %s16_s11, 128, %s18_s13, [#allocation4]  }
   0x5   :  { %s146_s17 = smov [#allocation6]  }
   0x6   :  { %s28_s18 = sshll.u32 %s146_s17, 4  ;;  %s29_s18 = int_to_ptr.vmem [resolvable:$true] %s28_s18 }
   0x7   :  { %31 = dma.hbm_to_vmem [thread:$0]  %s27_s16, 128, %s29_s18, [#allocation7]  }
   0x8   :  { %139 = dma.done.wait [#allocation4], 128  }
   0x9   :  { %140 = vsyncadd [#allocation4], 4294967168 }
   0xa   :  { %141 = dma.done.wait [#allocation7], 128  }
   0xb   :  { %142 = vsyncadd [#allocation7], 4294967168  ;;  %s147_s19 = smov [#allocation8]   ;;  %s53_s22 = sshll.u32 %s174_s2, 4  ;;  %v40_v0 = vld [vmem:[#allocation3] sm:$0xff]  ;;  %v41_v1 = vld [vmem:[#allocation6] sm:$0xff]  ;;  %s54_s22 = int_to_ptr.hbm [resolvable:$true] %s53_s22 }
   0xc   :  { %s51_s0 = sshll.u32 %s147_s19, 4  ;;  %v42_v2 = vadd.f32 %v41_v1, %v40_v0  ;;  %s52_s0 = int_to_ptr.vmem [resolvable:$true] %s51_s0 }
   0xe   :  { %45 = vst [vmem:[#allocation8] sm:$0xff] %v42_v2 }
   0xf   :  { %56 = dma.vmem_to_hbm [thread:$0]  %s52_s0, 128, %s54_s22, [#allocation5]  }
  0x10   :  { %143 = dma.done.wait [#allocation5], 128  }
  0x11   :  { %144 = vsyncadd [#allocation5], 4294967168 }
  0x12   :  { %61 = vsyncpa [#allocation4], 1 }
  0x13   :  { %62 = vsyncpa [#allocation7], 1 }
  0x14   :  { %63 = vsyncpa [#allocation5], 1 }

// kernel: tpu_custom_call.1
= control target key start
LH: loop header
LB: loop body
LE: loop exit
PB: predicated region body
PF: predicated region fallthrough
CT: control target
= control target key end

     0   :  { %7 = vsyncpa [#allocation3], 0  ;;  %s293_s0 = inlined_call_operand.vmem [shape: s32[16,1], index: 0, kind: input, shape index: {}]   ;;  %s294_s1 = inlined_call_operand.hbm [shape: bf16[128,128], index: 1, kind: input, shape index: {}]   ;;  %s295_s2 = inlined_call_operand.hbm [shape: bf16[16,128], index: 2, kind: output, shape index: {}]  }
   0x1   :  { %8 = vsyncpa [#allocation4], 0  ;;  %s15_s11 = sshll.u32 %s294_s1, 4  ;;  %s254_s12 = smov [#allocation2]   ;;  %s16_s11 = int_to_ptr.hbm [resolvable:$true] %s15_s11 }
   0x2   :  { %s17_s13 = sshll.u32 %s254_s12, 4  ;;  %s255_s14 = smov 64   ;;  %s18_s13 = int_to_ptr.vmem [resolvable:$true] %s17_s13 }
   0x3   :  { %s256_s15 = smov 4  }
   0x4   :  { %23 = dma.hbm_to_vmem [thread:$0]  %s16_s11, 1024, %s18_s13, [#allocation3], %s255_s14, %s255_s14, %s256_s15  }
   0x5   :  { %250 = dma.done.wait [#allocation3], 1024  }
   0x6   :  { %251 = vsyncadd [#allocation3], 4294966272  ;;  %v257_v0 = vmov 0   ;;  %v28_v1 = vld [vmem:[%s293_s0] sm:$0xff]  ;;  %v189_v2 = vld [vmem:[#allocation2 + $0x38] sm:$0xff]  ;;  %v30_v12 = vlaneseq  ;;  %s133_s22 = sshll.u32 %s295_s2, 4  ;;  %s134_s22 = int_to_ptr.hbm [resolvable:$true] %s133_s22 }
   0x7   :  { %201 = vset.pattern.permute.xlu0 %v257_v0  ;;  %109 = vmatpush.bf16.msra.mxu0 %v189_v2  ;;  %v188_v3 = vld [vmem:[#allocation2 + $0x30] sm:$0xff]  ;;  %v29_v4 = vld [vmem:[%s293_s0 + $0x8] sm:$0xff]  ;;  %v186_v6 = vld [vmem:[#allocation2 + $0x20] sm:$0xff]  ;;  %v258_v15 = vmov 1.0|1.0   ;;  %s259_s0 = smov [#allocation5]  }
   0x8   :  { %33 = vperm.xlu0 %201, %v28_v1   ;;  %v187_v5 = vld [vmem:[#allocation2 + $0x28] sm:$0xff]  ;;  %v185_v7 = vld [vmem:[#allocation2 + $0x18] sm:$0xff]  ;;  %v184_v8 = vld [vmem:[#allocation2 + $0x10] sm:$0xff]  ;;  %v31_v13 = vand.u32 127, %v30_v12  ;;  %s131_s19 = sshll.u32 %s259_s0, 4  ;;  %s132_s19 = int_to_ptr.vmem [resolvable:$true] %s131_s19 }
   0x9   :  { %v183_v9 = vld [vmem:[#allocation2 + $0x8] sm:$0xff]  ;;  %v182_v10 = vld [vmem:[#allocation2] sm:$0xff] }
   0xb   :  { %110 = vmatpush.bf16.msra.mxu0 %v188_v3 }
   0xf   :  { %111 = vmatpush.bf16.msra.mxu0 %v187_v5 }
  0x10   :  { %36 = vperm.xlu0 %201, %v29_v4  }
  0x13   :  { %112 = vmatpush.bf16.msra.mxu0 %v186_v6 }
  0x17   :  { %113 = vmatpush.bf16.msra.mxu0 %v185_v7 }
  0x1b   :  { %114 = vmatpush.bf16.msra.mxu0 %v184_v8 }
  0x1f   :  { %115 = vmatpush.bf16.msra.mxu0 %v183_v9 }
  0x23   :  { %116 = vmatpush.bf16.msra.mxu0 %v182_v10 }
  0x7a   :  { %v34_v11 = vpop.permute.xlu0 %33 }
  0x7b   :  { %vm38_vm0 = vcmp.eq.s32.totalorder %v31_v13, %v34_v11 }
  0x82   :  { %v37_v14 = vpop.permute.xlu0 %36 }
  0x83   :  { %vm39_vm1 = vcmp.eq.s32.totalorder %v31_v13, %v37_v14 }
  0x84   :  { %vm180_vm2 = vmpackc.low %vm39_vm1, %vm38_vm0 }
  0x85   :  { %181 = vmatmul.msk.bf16.vlgmr.msra.gmra.mxu0 %vm180_vm2, %v258_v15 }
 0x102   :  { %v118_v16 = vpop.f32.mrf.mxu0 }
 0x10a   :  { %v120_v17 = vpop.f32.mrf.mxu0 }
 0x10b   :  { %v193_v18 = vpack.c.bf16 %v120_v17, %v118_v16 }
 0x10d   :  { %194 = vst [vmem:[#allocation5] sm:$0xff] %v193_v18  }
 0x10e   :  { %139 = dma.vmem_to_hbm [thread:$0]  %s132_s19, 128, %s134_s22, [#allocation4], %s255_s14, %s255_s14, %s256_s15  }
 0x10f   :  { %252 = dma.done.wait [#allocation4], 128  }
 0x110   :  { %253 = vsyncadd [#allocation4], 4294967168 }
 0x111   :  { %144 = vsyncpa [#allocation3], 1 }
 0x112   :  { %145 = vsyncpa [#allocation4], 1 }

</bundles_post_ra>
